<compile_context>
chip_gen: v5e
topology: v5e:2x2
jax: 0.10.0
libtpu: 0.0.40
codegen_flags: <defaults>
</compile_context>

<pallas_src>
import functools
from typing import Optional, Sequence, Tuple

import jax
import jax.numpy as jnp
from jax.experimental import pallas as pl
from jax.experimental.pallas import tpu as pltpu

_LANE = 128


def _round_up(n: int, m: int) -> int:
    return ((n + m - 1) // m) * m


def _device_vmem_capacity_bytes() -> int:
    """Best-effort VMEM capacity query; falls back to the smallest (v7x) size."""
    try:
        return int(pltpu.get_tpu_info().vmem_capacity_bytes)
    except Exception:
        return 64 << 20  # v7x per-TensorCore VMEM: safe lower bound on all gens


def _apply_activation(h, name: Optional[str]):
    # h is f32; keep activation math in f32 (v5e has no bf16 VPU/EUP).
    if name is None:
        return h
    if name == "tanh":
        return jnp.tanh(h)
    if name == "relu":
        return jnp.maximum(h, 0.0)
    if name == "sigmod":  # (sic) matches the torch module's spelling for Sigmoid
        return 1.0 / (1.0 + jnp.exp(-h))  # exact sigmoid; exp/div run on EUP
    return h


def _mlp_kernel(x_ref, *refs, activations: Tuple[Optional[str], ...], compute_dtype):
    """refs = (w0, b0, w1, b1, ..., out_ref).

    Weights/biases are resident (constant index_map); x/out are tiled on batch.
    Weights are already stored in compute_dtype -> no per-step recast.
    """
    out_ref = refs[-1]
    param_refs = refs[:-1]
    num_layers = len(param_refs) // 2

    h = x_ref[...]                       # already compute_dtype (bf16/f32)
    for i in range(num_layers):
        w = param_refs[2 * i][...]       # stored in compute_dtype
        b = param_refs[2 * i + 1][...]   # f32, [1, out_i] broadcast add
        z = jnp.dot(h, w, preferred_element_type=jnp.float32) + b
        z = _apply_activation(z, activations[i])           # f32
        h = z if i == num_layers - 1 else z.astype(compute_dtype)
    out_ref[...] = h.astype(out_ref.dtype)


class PallasNet:
    """JAX/Pallas equivalent of the torch `Net` module."""

    def __init__(
        self,
        input_dim: int,
        output_dim: int = 0,
        hidden_layers: Sequence[int] = (128,),
        activation: str = "tanh",
        output_activation: Optional[str] = None,
        key: jax.Array = None,
        param_dtype=jnp.float32,
        compute_dtype=jnp.bfloat16,
        output_dtype=jnp.float32,
        batch_tile: int = 1024,
    ):
        assert len(hidden_layers) >= 1
        assert activation is not None
        activation = activation.lower()
        if output_activation is not None:
            output_activation = output_activation.lower()
        self.input_dim = input_dim
        self.output_dim = output_dim
        self.param_dtype = param_dtype
        self.compute_dtype = compute_dtype
        self.output_dtype = output_dtype
        self.batch_tile = int(batch_tile)

        if key is None:
            key = jax.random.PRNGKey(0)

        dims = [input_dim] + list(hidden_layers)
        # Match torch exactly: hidden activation appended only for tanh/relu,
        # output activation only for tanh/'sigmod'; otherwise identity.
        acts = [activation if activation in ("tanh", "relu") else None] * len(hidden_layers)
        if output_dim > 0:
            dims.append(output_dim)
            acts.append(output_activation if output_activation in ("tanh", "sigmod") else None)

        self.activations: Tuple[Optional[str], ...] = tuple(acts)
        self.dims = dims
        self.final_dim = dims[-1]

        # Row packing for the compute dtype: 8 rows/vreg for f32, 16 for bf16.
        self._row_pack = 8 * max(1, 4 // jnp.dtype(compute_dtype).itemsize)
        # Input feature dim: pad only to the sublane pack (keeps x HBM traffic
        # near logical size).  Hidden/output dims: pad to 128 lanes so the MXU
        # columns are full and the output block is lane-dense (unmasked stores).
        self.in_dim_pad = _round_up(input_dim, self._row_pack)
        self.dims_pad = [self.in_dim_pad] + [_round_up(d, _LANE) for d in dims[1:]]
        self.out_dim_pad = self.dims_pad[-1]

        self._vmem_capacity = _device_vmem_capacity_bytes()

        self.params = []       # unpadded f32 [w0, b0, ...] (reference path)
        self.params_pad = []   # padded; weights in compute_dtype, biases in f32
        for d0, d1, d0p, d1p in zip(dims[:-1], dims[1:], self.dims_pad[:-1], self.dims_pad[1:]):
            key, kw, kb = jax.random.split(key, 3)
            bound = 1.0 / float(d0) ** 0.5
            # mimic torch.nn.Linear default init: U(-1/sqrt(fan_in), 1/sqrt(fan_in))
            w = jax.random.uniform(kw, (d0, d1), param_dtype, -bound, bound)  # [in, out]
            b = jax.random.uniform(kb, (1, d1), param_dtype, -bound, bound)
            self.params += [w, b]
            w_p = jnp.zeros((d0p, d1p), compute_dtype).at[:d0, :d1].set(w.astype(compute_dtype))
            b_p = jnp.zeros((1, d1p), jnp.float32).at[:, :d1].set(b.astype(jnp.float32))
            self.params_pad += [w_p, b_p]

        # jit the whole wrapper once (cast + pad + pallas_call + slice).
        self._forward = jax.jit(self._make_forward())

    # ---------------- static helpers (trace-time python) ----------------

    def _choose_tb(self, B: int) -> int:
        pack = self._row_pack
        b_rnd = _round_up(B, pack)
        tb = min(self.batch_tile, b_rnd)
        # Keep >=2 grid steps when the batch is large so v7x's second TensorCore
        # gets work under dimension_semantics=("parallel",).
        if b_rnd > 2 * 256:
            tb = min(tb, _round_up(pl.cdiv(b_rnd, 2), 256))
        return _round_up(max(tb, pack), pack)

    def _vmem_limit_bytes(self, TB: int) -> int:
        c_sz = jnp.dtype(self.compute_dtype).itemsize
        o_sz = jnp.dtype(self.output_dtype).itemsize
        # Conservative: assume default double-buffering on every operand.
        w_bytes = 2 * sum(int(p.size) * p.dtype.itemsize for p in self.params_pad)
        io_bytes = 2 * TB * self.in_dim_pad * c_sz + 2 * TB * self.out_dim_pad * o_sz
        act_bytes = 3 * TB * max(self.dims_pad) * 4  # f32 intermediates, generous
        est = w_bytes + io_bytes + act_bytes + (4 << 20)
        cap = int(0.75 * self._vmem_capacity)  # device-relative cap (v7x = 64 MiB physical)
        # TODO(synk): if padded weight bytes approach this cap (very large hidden
        # layers, especially on v7x), add an 'arbitrary' grid axis tiling the N dim
        # of each layer instead of keeping all weights fully resident.
        return int(min(max(est, 16 << 20), cap))

    # ---------------- Pallas forward ----------------

    def _make_forward(self):
        activations = self.activations
        compute_dtype = self.compute_dtype
        output_dtype = self.output_dtype
        input_dim = self.input_dim
        in_dim_pad = self.in_dim_pad
        out_dim_pad = self.out_dim_pad
        final_dim = self.final_dim

        kernel = functools.partial(
            _mlp_kernel, activations=activations, compute_dtype=compute_dtype)

        def forward(x, *params):
            B = x.shape[0]
            TB = self._choose_tb(B)
            B_pad = _round_up(B, TB)

            # Cast to compute dtype + zero-pad batch / input feature (exact:
            # padded rows/cols contribute zero and are sliced off below).
            x_pad = jnp.pad(x.astype(compute_dtype),
                            ((0, B_pad - B), (0, in_dim_pad - input_dim)))

            in_specs = [pl.BlockSpec((TB, in_dim_pad), lambda i: (i, 0))]   # x: batch tiled
            in_specs += [pl.BlockSpec(p.shape, lambda i: (0, 0)) for p in params]  # resident
            out_spec = pl.BlockSpec((TB, out_dim_pad), lambda i: (i, 0))    # lane-dense

            out_pad = pl.pallas_call(
                kernel,
                out_shape=jax.ShapeDtypeStruct((B_pad, out_dim_pad), output_dtype),
                grid_spec=pltpu.PrefetchScalarGridSpec(
                    num_scalar_prefetch=0,
                    grid=(B_pad // TB,),
                    in_specs=in_specs,
                    out_specs=out_spec,
                ),
                compiler_params=pltpu.CompilerParams(
                    dimension_semantics=("parallel",),
                    vmem_limit_bytes=self._vmem_limit_bytes(TB),
                ),
            )(x_pad, *params)
            return out_pad[:B, :final_dim]

        return forward

    def __call__(self, x: jax.Array) -> jax.Array:
        B, D = x.shape
        assert D == self.input_dim
        return self._forward(x, *self.params_pad)

    # ---------------- pure-JAX reference ----------------

    def reference(self, x: jax.Array, compute_dtype=None) -> jax.Array:
        if compute_dtype is None:
            compute_dtype = self.compute_dtype
        h = x.astype(jnp.float32)
        for i in range(len(self.params) // 2):
            w, b = self.params[2 * i], self.params[2 * i + 1]
            h = jnp.dot(h.astype(compute_dtype), w.astype(compute_dtype),
                        preferred_element_type=jnp.float32) + b.astype(jnp.float32)
            a = self.activations[i]
            if a == "tanh":
                h = jnp.tanh(h)
            elif a == "relu":
                h = jnp.maximum(h, 0.0)
            elif a == "sigmod":
                h = 1.0 / (1.0 + jnp.exp(-h))
        return h.astype(self.output_dtype)


if __name__ == "__main__":
    key = jax.random.PRNGKey(0)
    k_in1, k_p1, k_p2, k_in2, k_p3, k_in3 = jax.random.split(key, 6)

    # Net 1: tanh hidden layers, linear output (non-aligned hidden/output padding).
    batch, input_dim, output_dim = 16, 32, 8
    net1 = PallasNet(input_dim, output_dim, hidden_layers=(128, 64),
                     activation="tanh", output_activation=None, key=k_p1)
    x1 = jax.random.normal(k_in1, (batch, input_dim), jnp.float32)
    out1 = jax.block_until_ready(net1(x1))                      # bf16 MXU path
    assert out1.shape == (batch, output_dim)
    assert jnp.allclose(out1, net1.reference(x1, jnp.bfloat16), atol=2e-2, rtol=2e-2), \
        "Pallas bf16-compute output mismatch vs reference"

    # Same params but f32 compute (same RNG key -> identical weights).
    net1_f32 = PallasNet(input_dim, output_dim, hidden_layers=(128, 64),
                         activation="tanh", output_activation=None, key=k_p1,
                         compute_dtype=jnp.float32)
    out1_f32 = jax.block_until_ready(net1_f32(x1))
    assert jnp.allclose(out1_f32, net1_f32.reference(x1, jnp.float32),
                        atol=1e-4, rtol=1e-4), \
        "Pallas f32-compute output mismatch vs reference"

    # Net 2: relu hidden + 'sigmod' output, tiny non-aligned batch and input dim.
    net2 = PallasNet(20, 4, hidden_layers=(32,), activation="relu",
                     output_activation="sigmod", key=k_p2)
    x2 = jax.random.normal(k_in2, (5, 20), jnp.float32)
    out2 = jax.block_until_ready(net2(x2))
    assert out2.shape == (5, 4)
    assert jnp.allclose(out2, net2.reference(x2, jnp.bfloat16), atol=2e-2, rtol=2e-2), \
        "Pallas sigmoid-output mismatch vs reference"

    # Net 3: small batch_tile to exercise a multi-step batch-tiled grid + padding.
    net3 = PallasNet(32, 8, hidden_layers=(64,), activation="tanh",
                     output_activation="tanh", key=k_p3, batch_tile=16)
    x3 = jax.random.normal(k_in3, (40, 32), jnp.float32)
    out3 = jax.block_until_ready(net3(x3))
    assert out3.shape == (40, 8)
    assert jnp.allclose(out3, net3.reference(x3, jnp.bfloat16), atol=2e-2, rtol=2e-2), \
        "Pallas multi-tile-grid output mismatch vs reference"

    print("KERNEL_OK")
</pallas_src>

<mosaic_0001>
module attributes {stable_mosaic.version = 11 : i64} {
  func.func @_mlp_kernel(%arg0: i32, %arg1: memref<16x32xbf16, #tpu.memory_space<vmem>>, %arg2: memref<32x128xbf16, #tpu.memory_space<vmem>>, %arg3: memref<1x128xf32, #tpu.memory_space<vmem>>, %arg4: memref<128x128xbf16, #tpu.memory_space<vmem>>, %arg5: memref<1x128xf32, #tpu.memory_space<vmem>>, %arg6: memref<128x128xbf16, #tpu.memory_space<vmem>>, %arg7: memref<1x128xf32, #tpu.memory_space<vmem>>, %arg8: memref<16x128xf32, #tpu.memory_space<vmem>>) attributes {dimension_semantics = [#tpu.dimension_semantics<parallel>], iteration_bounds = array<i64: 1>, scalar_prefetch = 0 : i64, scratch_operands = 0 : i64, tpu.core_type = #tpu.core_type<tc>, window_params = [{transform_indices = @transform_0, window_bounds = array<i64: 16, 32>}, {pipeline_mode = #tpu.pipeline_mode<synchronous>, transform_indices = @transform_1, window_bounds = array<i64: 32, 128>}, {pipeline_mode = #tpu.pipeline_mode<synchronous>, transform_indices = @transform_2, window_bounds = array<i64: 1, 128>}, {pipeline_mode = #tpu.pipeline_mode<synchronous>, transform_indices = @transform_3, window_bounds = array<i64: 128, 128>}, {pipeline_mode = #tpu.pipeline_mode<synchronous>, transform_indices = @transform_4, window_bounds = array<i64: 1, 128>}, {pipeline_mode = #tpu.pipeline_mode<synchronous>, transform_indices = @transform_5, window_bounds = array<i64: 128, 128>}, {pipeline_mode = #tpu.pipeline_mode<synchronous>, transform_indices = @transform_6, window_bounds = array<i64: 1, 128>}, {transform_indices = @transform_7, window_bounds = array<i64: 16, 128>}]} {
    %c0 = arith.constant 0 : index
    %c0_0 = arith.constant 0 : index
    %0 = vector.load %arg1[%c0, %c0_0] : memref<16x32xbf16, #tpu.memory_space<vmem>>, vector<16x32xbf16>
    %c0_1 = arith.constant 0 : index
    %c0_2 = arith.constant 0 : index
    %1 = vector.load %arg2[%c0_1, %c0_2] : memref<32x128xbf16, #tpu.memory_space<vmem>>, vector<32x128xbf16>
    %c0_3 = arith.constant 0 : index
    %c0_4 = arith.constant 0 : index
    %2 = vector.load %arg3[%c0_3, %c0_4] : memref<1x128xf32, #tpu.memory_space<vmem>>, vector<1x128xf32>
    %cst = arith.constant dense<0.000000e+00> : vector<16x128xf32>
    %3 = tpu.matmul %0, %1, %cst {dimension_numbers = #tpu.dot_dimension_numbers<[1], [0], [0], [1], [0, 0, 1, 1], [], []>} : vector<16x32xbf16>, vector<32x128xbf16>, vector<16x128xf32> -> vector<16x128xf32>
    %4 = vector.broadcast %2 : vector<1x128xf32> to vector<16x128xf32>
    %5 = arith.addf %3, %4 : vector<16x128xf32>
    %6 = math.tanh %5 : vector<16x128xf32>
    %7 = arith.truncf %6 : vector<16x128xf32> to vector<16x128xbf16>
    %c0_5 = arith.constant 0 : index
    %c0_6 = arith.constant 0 : index
    %8 = vector.load %arg4[%c0_5, %c0_6] : memref<128x128xbf16, #tpu.memory_space<vmem>>, vector<128x128xbf16>
    %c0_7 = arith.constant 0 : index
    %c0_8 = arith.constant 0 : index
    %9 = vector.load %arg5[%c0_7, %c0_8] : memref<1x128xf32, #tpu.memory_space<vmem>>, vector<1x128xf32>
    %cst_9 = arith.constant dense<0.000000e+00> : vector<16x128xf32>
    %10 = tpu.matmul %7, %8, %cst_9 {dimension_numbers = #tpu.dot_dimension_numbers<[1], [0], [0], [1], [0, 0, 1, 1], [], []>} : vector<16x128xbf16>, vector<128x128xbf16>, vector<16x128xf32> -> vector<16x128xf32>
    %11 = vector.broadcast %9 : vector<1x128xf32> to vector<16x128xf32>
    %12 = arith.addf %10, %11 : vector<16x128xf32>
    %13 = math.tanh %12 : vector<16x128xf32>
    %14 = arith.truncf %13 : vector<16x128xf32> to vector<16x128xbf16>
    %c0_10 = arith.constant 0 : index
    %c0_11 = arith.constant 0 : index
    %15 = vector.load %arg6[%c0_10, %c0_11] : memref<128x128xbf16, #tpu.memory_space<vmem>>, vector<128x128xbf16>
    %c0_12 = arith.constant 0 : index
    %c0_13 = arith.constant 0 : index
    %16 = vector.load %arg7[%c0_12, %c0_13] : memref<1x128xf32, #tpu.memory_space<vmem>>, vector<1x128xf32>
    %cst_14 = arith.constant dense<0.000000e+00> : vector<16x128xf32>
    %17 = tpu.matmul %14, %15, %cst_14 {dimension_numbers = #tpu.dot_dimension_numbers<[1], [0], [0], [1], [0, 0, 1, 1], [], []>} : vector<16x128xbf16>, vector<128x128xbf16>, vector<16x128xf32> -> vector<16x128xf32>
    %18 = vector.broadcast %16 : vector<1x128xf32> to vector<16x128xf32>
    %19 = arith.addf %17, %18 : vector<16x128xf32>
    %c0_15 = arith.constant 0 : index
    %c0_16 = arith.constant 0 : index
    %20 = vector.load %arg8[%c0_15, %c0_16] : memref<16x128xf32, #tpu.memory_space<vmem>>, vector<16x128xf32>
    tpu.vector_store %arg8[%c0_15, %c0_16], %19 {strides = array<i32>} : memref<16x128xf32, #tpu.memory_space<vmem>>, vector<16x128xf32>,
    return
  }
  func.func @transform_0(%arg0: i32) -> (i32, i32) {
    %c0_i32 = arith.constant 0 : i32
    %c0_i32_0 = arith.constant 0 : i32
    return %arg0, %c0_i32 : i32, i32
  }
  func.func @transform_1(%arg0: i32) -> (i32, i32) {
    %c0_i32 = arith.constant 0 : i32
    %c0_i32_0 = arith.constant 0 : i32
    %c0_i32_1 = arith.constant 0 : i32
    return %c0_i32, %c0_i32_0 : i32, i32
  }
  func.func @transform_2(%arg0: i32) -> (i32, i32) {
    %c0_i32 = arith.constant 0 : i32
    %c0_i32_0 = arith.constant 0 : i32
    %c0_i32_1 = arith.constant 0 : i32
    return %c0_i32, %c0_i32_0 : i32, i32
  }
  func.func @transform_3(%arg0: i32) -> (i32, i32) {
    %c0_i32 = arith.constant 0 : i32
    %c0_i32_0 = arith.constant 0 : i32
    %c0_i32_1 = arith.constant 0 : i32
    return %c0_i32, %c0_i32_0 : i32, i32
  }
  func.func @transform_4(%arg0: i32) -> (i32, i32) {
    %c0_i32 = arith.constant 0 : i32
    %c0_i32_0 = arith.constant 0 : i32
    %c0_i32_1 = arith.constant 0 : i32
    return %c0_i32, %c0_i32_0 : i32, i32
  }
  func.func @transform_5(%arg0: i32) -> (i32, i32) {
    %c0_i32 = arith.constant 0 : i32
    %c0_i32_0 = arith.constant 0 : i32
    %c0_i32_1 = arith.constant 0 : i32
    return %c0_i32, %c0_i32_0 : i32, i32
  }
  func.func @transform_6(%arg0: i32) -> (i32, i32) {
    %c0_i32 = arith.constant 0 : i32
    %c0_i32_0 = arith.constant 0 : i32
    %c0_i32_1 = arith.constant 0 : i32
    return %c0_i32, %c0_i32_0 : i32, i32
  }
  func.func @transform_7(%arg0: i32) -> (i32, i32) {
    %c0_i32 = arith.constant 0 : i32
    %c0_i32_0 = arith.constant 0 : i32
    return %arg0, %c0_i32 : i32, i32
  }
}

</mosaic_0001>

<bundles_post_ra>
// kernel: forward.1
= control target key start
LH: loop header
LB: loop body
LE: loop exit
PB: predicated region body
PF: predicated region fallthrough
CT: control target
= control target key end

     0   :  { %12 = vsyncpa [#allocation3], 0  ;;  %s519_s0 = inlined_call_operand.vmem [shape: bf16[16,32], index: 0, kind: input, shape index: {}]   ;;  %s520_s1 = inlined_call_operand.vmem [shape: bf16[32,128], index: 1, kind: input, shape index: {}]   ;;  %s521_s2 = inlined_call_operand.vmem [shape: f32[1,128], index: 2, kind: input, shape index: {}]   ;;  %s522_s3 = inlined_call_operand.hbm [shape: bf16[128,128], index: 3, kind: input, shape index: {}]   ;;  %s523_s4 = inlined_call_operand.vmem [shape: f32[1,128], index: 4, kind: input, shape index: {}]   ;;  %s524_s5 = inlined_call_operand.hbm [shape: bf16[128,128], index: 5, kind: input, shape index: {}]   ;;  %s525_s6 = inlined_call_operand.vmem [shape: f32[1,128], index: 6, kind: input, shape index: {}]   ;;  %s526_s7 = inlined_call_operand.vmem [shape: f32[16,128], index: 7, kind: output, shape index: {}]  }
   0x1   :  { %s24_s26 = sshll.u32 %s522_s3, 4  ;;  %s25_s26 = int_to_ptr.hbm [resolvable:$true] %s24_s26 }
   0x2   :  { %13 = vsyncpa [#allocation5], 0  ;;  %s445_s27 = smov [#allocation2]   ;;  %s39_s8 = sshll.u32 %s524_s5, 4  ;;  %s40_s8 = int_to_ptr.hbm [resolvable:$true] %s39_s8 }
   0x3   :  { %s26_s28 = sshll.u32 %s445_s27, 4  ;;  %s446_s9 = smov 64   ;;  %s27_s28 = int_to_ptr.vmem [resolvable:$true] %s26_s28 }
   0x4   :  { %s447_s10 = smov 4   ;;  %s448_s11 = smov [#allocation4]  }
   0x5   :  { %32 = dma.hbm_to_vmem [thread:$0]  %s25_s26, 1024, %s27_s28, [#allocation3], %s446_s9, %s446_s9, %s447_s10  }
   0x6   :  { %s41_s12 = sshll.u32 %s448_s11, 4  ;;  %s42_s12 = int_to_ptr.vmem [resolvable:$true] %s41_s12 }
   0x7   :  { %47 = dma.hbm_to_vmem [thread:$0]  %s40_s8, 1024, %s42_s12, [#allocation5], %s446_s9, %s446_s9, %s447_s10  }
   0x8   :  { %441 = dma.done.wait [#allocation3], 1024  }
   0x9   :  { %442 = vsyncadd [#allocation3], 4294966272 }
   0xa   :  { %443 = dma.done.wait [#allocation5], 1024  }
   0xb   :  { %444 = vsyncadd [#allocation5], 4294966272  ;;  %v361_v0 = vld [vmem:[%s520_s1 + $0x8] sm:$0xff]  ;;  %v369_v1 = vld [vmem:[#allocation2 + $0x38] sm:$0xff]  ;;  %vm86_vm0 = vcmask 261120  }
   0xc   :  { %96 = vmatpush.bf16.msra.mxu0 %v361_v0  ;;  %v360_v2 = vld [vmem:[%s520_s1] sm:$0xff]  ;;  %175 = vmatpush.bf16.msra.mxu1 %v369_v1  ;;  %v368_v3 = vld [vmem:[#allocation2 + $0x30] sm:$0xff]  ;;  %v367_v5 = vld [vmem:[#allocation2 + $0x28] sm:$0xff] }
   0xd   :  { %v359_v4 = vld [vmem:[%s519_s0] sm:$0xff]  ;;  %v365_v7 = vld [vmem:[#allocation2 + $0x18] sm:$0xff]  ;;  %v364_v8 = vld [vmem:[#allocation2 + $0x10] sm:$0xff] }
   0xe   :  { %v366_v6 = vld [vmem:[#allocation2 + $0x20] sm:$0xff]  ;;  %v363_v9 = vld [vmem:[#allocation2 + $0x8] sm:$0xff]  ;;  %v377_v11 = vld [vmem:[#allocation4 + $0x38] sm:$0xff] }
   0xf   :  { %v362_v10 = vld [vmem:[#allocation2] sm:$0xff]  ;;  %260 = vmatpush.bf16.msra.mxu2 %v377_v11  ;;  %v376_v12 = vld [vmem:[#allocation4 + $0x30] sm:$0xff]  ;;  %v375_v13 = vld [vmem:[#allocation4 + $0x28] sm:$0xff] }
  0x10   :  { %97 = vmatpush.bf16.msra.mxu0 %v360_v2  ;;  %176 = vmatpush.bf16.msra.mxu1 %v368_v3  ;;  %v382_v15 = vld [vmem:[%s521_s2] ss:$0 sm:$0xff]  ;;  %v373_v23 = vld [vmem:[#allocation4 + $0x18] sm:$0xff]  ;;  %v372_v24 = vld [vmem:[#allocation4 + $0x10] sm:$0xff] }
  0x11   :  { %v374_v22 = vld [vmem:[#allocation4 + $0x20] sm:$0xff]  ;;  %v371_v25 = vld [vmem:[#allocation4 + $0x8] sm:$0xff] }
  0x12   :  { %v370_v26 = vld [vmem:[#allocation4] sm:$0xff] }
  0x13   :  { %294 = vmatmul.msk.bf16.vlgmr.msra.gmra.mxu0 %vm86_vm0, %v359_v4  ;;  %261 = vmatpush.bf16.msra.mxu2 %v376_v12  ;;  %v383_v28 = vld [vmem:[%s523_s4] ss:$0 sm:$0xff] }
  0x14   :  { %177 = vmatpush.bf16.msra.mxu1 %v367_v5  ;;  %v384_v35 = vld [vmem:[%s525_s6] ss:$0 sm:$0xff] }
  0x17   :  { %262 = vmatpush.bf16.msra.mxu2 %v375_v13 }
  0x18   :  { %178 = vmatpush.bf16.msra.mxu1 %v366_v6 }
  0x1b   :  { %263 = vmatpush.bf16.msra.mxu2 %v374_v22 }
  0x1c   :  { %179 = vmatpush.bf16.msra.mxu1 %v365_v7 }
  0x1f   :  { %264 = vmatpush.bf16.msra.mxu2 %v373_v23 }
  0x20   :  { %180 = vmatpush.bf16.msra.mxu1 %v364_v8 }
  0x23   :  { %265 = vmatpush.bf16.msra.mxu2 %v372_v24 }
  0x24   :  { %181 = vmatpush.bf16.msra.mxu1 %v363_v9 }
  0x27   :  { %266 = vmatpush.bf16.msra.mxu2 %v371_v25 }
  0x28   :  { %182 = vmatpush.bf16.msra.mxu1 %v362_v10 }
  0x2b   :  { %267 = vmatpush.bf16.msra.mxu2 %v370_v26 }
  0x90   :  { %v99_v14 = vpop.f32.mrf.mxu0 }
  0x91   :  { %v100_v16 = vadd.f32 %v382_v15, %v99_v14 }
  0x93   :  { %385 = vtanh.f32 %v100_v16 }
  0x98   :  { %v101_v17 = vpop.f32.mrf.mxu0 }
  0x99   :  { %v102_v18 = vadd.f32 %v382_v15, %v101_v17  ;;  %v386_v19 = vpop.eup %385 }
  0x9b   :  { %387 = vtanh.f32 %v102_v18 }
  0xa1   :  { %v388_v20 = vpop.eup %387 }
  0xa2   :  { %v106_v21 = vpack.c.bf16 %v388_v20, %v386_v19 }
  0xa4   :  { %183 = vmatmul.bf16.vlgmr.msra.gmra.mxu1 %v106_v21 }
 0x121   :  { %v184_v27 = vpop.f32.mrf.mxu1 }
 0x122   :  { %v185_v29 = vadd.f32 %v383_v28, %v184_v27 }
 0x124   :  { %389 = vtanh.f32 %v185_v29 }
 0x129   :  { %v186_v30 = vpop.f32.mrf.mxu1 }
 0x12a   :  { %v187_v31 = vadd.f32 %v383_v28, %v186_v30  ;;  %v390_v32 = vpop.eup %389 }
 0x12c   :  { %391 = vtanh.f32 %v187_v31 }
 0x132   :  { %v392_v33 = vpop.eup %391 }
 0x133   :  { %v191_v34 = vpack.c.bf16 %v392_v33, %v390_v32 }
 0x135   :  { %268 = vmatmul.bf16.vlgmr.msra.gmra.mxu2 %v191_v34 }
 0x1b8   :  { %v269_v36 = vpop.f32.mrf.mxu2 }
 0x1b9   :  { %v270_v37 = vadd.f32 %v384_v35, %v269_v36 }
 0x1bb   :  { %274 = vst [vmem:[%s526_s7] sm:$0xff] %v270_v37 }
 0x1c0   :  { %v271_v38 = vpop.f32.mrf.mxu2 }
 0x1c1   :  { %v272_v39 = vadd.f32 %v384_v35, %v271_v38 }
 0x1c3   :  { %275 = vst [vmem:[%s526_s7 + $0x8] sm:$0xff] %v272_v39 }
 0x1c4   :  { %280 = vsyncpa [#allocation3], 1 }
 0x1c5   :  { %281 = vsyncpa [#allocation5], 1 }

</bundles_post_ra>
